<compile_context>
chip_gen: v7x
topology: tpu7x:2x2x1
jax: 0.10.0
libtpu: 0.0.40
codegen_flags: <defaults>
</compile_context>

<pallas_src>
import functools

import jax
import jax.numpy as jnp
from jax import lax
from jax.experimental import pallas as pl
from jax.experimental.pallas import tpu as pltpu

_LANE = 128   # lane width: feature dims padded to a multiple of this
_TM = 512     # target dst-node tile (rows of A_hat / output rows)
_TK = 1024    # target src-node reduction tile (cols of A_hat)


def _round_up(v, m):
    return ((v + m - 1) // m) * m


def _pick_tile(extent, target):
    """Largest multiple of _LANE <= target that divides extent (extent % _LANE == 0)."""
    t = min(target, extent)
    while extent % t:
        t -= _LANE
    return t


def _pad2d(a, rows, cols):
    return jnp.pad(a, ((0, rows - a.shape[0]), (0, cols - a.shape[1])))


# ---------------------------------------------------------------------------
# Kernel 1: XW = X @ W   (hoisted out of the aggregation kernel, once/layer)
# ---------------------------------------------------------------------------
def _xw_kernel(x_ref, w_ref, o_ref):
    # Cast X tile to bf16 on the fly; MXU accumulates in f32.
    xw = jnp.dot(x_ref[...].astype(jnp.bfloat16), w_ref[...],
                 preferred_element_type=jnp.float32)
    o_ref[...] = xw.astype(o_ref.dtype)


def _xw_matmul(x_pad, w_bf16, tm):
    n_pad, f_in_p = x_pad.shape
    f_out_p = w_bf16.shape[1]
    return pl.pallas_call(
        _xw_kernel,
        out_shape=jax.ShapeDtypeStruct((n_pad, f_out_p), jnp.bfloat16),
        grid_spec=pltpu.PrefetchScalarGridSpec(
            num_scalar_prefetch=0,
            grid=(n_pad // tm,),
            in_specs=[
                pl.BlockSpec((tm, f_in_p), lambda i: (i, 0)),
                pl.BlockSpec((f_in_p, f_out_p), lambda i: (0, 0)),
            ],
            out_specs=pl.BlockSpec((tm, f_out_p), lambda i: (i, 0)),
        ),
        compiler_params=pltpu.CompilerParams(
            dimension_semantics=("parallel",)),
    )(x_pad, w_bf16)


# ---------------------------------------------------------------------------
# Kernel 2: Z = ReLU(A_hat @ XW + b)   tiled reduction over src nodes
# ---------------------------------------------------------------------------
def _aggregate_kernel(a_ref, xw_ref, b_ref, o_ref, acc_ref):
    k = pl.program_id(1)

    @pl.when(k == 0)
    def _():
        acc_ref[...] = jnp.zeros_like(acc_ref)

    acc_ref[...] += jnp.dot(a_ref[...], xw_ref[...],
                            preferred_element_type=jnp.float32)

    @pl.when(k == pl.num_programs(1) - 1)
    def _():
        z = acc_ref[...] + b_ref[...]        # bias only in the epilogue
        o_ref[...] = jnp.maximum(z, 0.0).astype(o_ref.dtype)


def _aggregate(a_bf16, xw_bf16, b_pad, tm, tk):
    n_pad = a_bf16.shape[0]
    f_out_p = xw_bf16.shape[1]
    return pl.pallas_call(
        _aggregate_kernel,
        out_shape=jax.ShapeDtypeStruct((n_pad, f_out_p), jnp.float32),
        grid_spec=pltpu.PrefetchScalarGridSpec(
            num_scalar_prefetch=0,
            grid=(n_pad // tm, n_pad // tk),
            in_specs=[
                pl.BlockSpec((tm, tk), lambda i, k: (i, k)),
                pl.BlockSpec((tk, f_out_p), lambda i, k: (k, 0)),
                pl.BlockSpec((1, f_out_p), lambda i, k: (0, 0)),
            ],
            out_specs=pl.BlockSpec((tm, f_out_p), lambda i, k: (i, 0)),
            scratch_shapes=[pltpu.VMEM((tm, f_out_p), jnp.float32)],
        ),
        compiler_params=pltpu.CompilerParams(
            dimension_semantics=("parallel", "arbitrary")),
    )(a_bf16, xw_bf16, b_pad)


# ---------------------------------------------------------------------------
# Glue: dense symmetrically normalized adjacency (PyG gcn_norm), f32
# ---------------------------------------------------------------------------
def build_norm_adj(edge_index, edge_weight, num_nodes):
    src = edge_index[0]
    dst = edge_index[1]
    if edge_weight is None:
        edge_weight = jnp.ones(src.shape[0], dtype=jnp.float32)
    a = jnp.zeros((num_nodes, num_nodes), jnp.float32)
    a = a.at[dst, src].add(edge_weight.astype(jnp.float32))   # A[dst, src]
    a = a + jnp.eye(num_nodes, dtype=jnp.float32)              # self-loops
    deg = jnp.sum(a, axis=1)
    dinv = jnp.where(deg > 0.0, lax.rsqrt(deg), 0.0)
    return dinv[:, None] * a * dinv[None, :]


# ---------------------------------------------------------------------------
# GCNEncoder forward: num_layers x (GCNConv + ReLU)
# ---------------------------------------------------------------------------
def init_params(key, input_dim, hidden_dim, num_layers):
    params = []
    dims = [input_dim] + [hidden_dim] * num_layers
    for i in range(num_layers):
        key, kw = jax.random.split(key)
        fan_in, fan_out = dims[i], dims[i + 1]
        scale = jnp.sqrt(6.0 / (fan_in + fan_out))     # Glorot-style init
        w = jax.random.uniform(kw, (fan_in, fan_out), jnp.float32, -scale, scale)
        b = jnp.zeros((fan_out,), jnp.float32)
        params.append((w, b))
    return params


@functools.partial(jax.jit, static_argnames=("num_nodes",))
def gcn_encoder_forward(params, x, edge_index, edge_weight, num_nodes):
    n_pad = _round_up(max(num_nodes, _LANE), _LANE)
    tm = _pick_tile(n_pad, _TM)
    tk = _pick_tile(n_pad, _TK)

    # Build A_hat once (f32), cast to bf16, pad; reused by every layer.
    a_hat = build_norm_adj(edge_index, edge_weight, num_nodes)
    a_bf16 = _pad2d(a_hat, n_pad, n_pad).astype(jnp.bfloat16)

    f_in0 = params[0][0].shape[0]
    z = _pad2d(x.astype(jnp.float32), n_pad, _round_up(f_in0, _LANE))

    for w, b in params:
        f_in, f_out = w.shape
        f_in_p = _round_up(f_in, _LANE)
        f_out_p = _round_up(f_out, _LANE)
        w_p = _pad2d(w, f_in_p, f_out_p).astype(jnp.bfloat16)
        b_p = jnp.pad(b, (0, f_out_p - f_out)).reshape(1, f_out_p)

        xw = _xw_matmul(z, w_p, tm)                 # (n_pad, f_out_p) bf16
        z = _aggregate(a_bf16, xw, b_p, tm, tk)     # (n_pad, f_out_p) f32

    f_out_last = params[-1][0].shape[1]
    return z[:num_nodes, :f_out_last]


# ---------------------------------------------------------------------------
if __name__ == "__main__":
    key = jax.random.PRNGKey(0)
    k_x, k_e, k_w, k_p = jax.random.split(key, 4)

    num_nodes = 16
    input_dim = 8
    hidden_dim = 32
    num_layers = 2
    num_edges = 40

    x = jax.random.normal(k_x, (num_nodes, input_dim), jnp.float32)
    edge_index = jax.random.randint(k_e, (2, num_edges), 0, num_nodes,
                                    dtype=jnp.int32)
    edge_weight = jax.random.uniform(k_w, (num_edges,), jnp.float32, 0.5, 1.5)

    params = init_params(k_p, input_dim, hidden_dim, num_layers)

    z = gcn_encoder_forward(params, x, edge_index, edge_weight, num_nodes)
    jax.block_until_ready(z)

    # Pure-JAX f32 reference of the same forward pass.
    a_ref = build_norm_adj(edge_index, edge_weight, num_nodes)
    z_ref = x
    for w, b in params:
        z_ref = jnp.maximum(a_ref @ (z_ref @ w) + b, 0.0)

    assert z.shape == (num_nodes, hidden_dim)
    assert bool(jnp.all(jnp.isfinite(z)))
    assert bool(jnp.allclose(z, z_ref, rtol=5e-2, atol=5e-2))
    print("KERNEL_OK")
</pallas_src>

<mosaic_0001>
module attributes {stable_mosaic.version = 11 : i64} {
  func.func @_aggregate_kernel(%arg0: i32, %arg1: i32, %arg2: memref<128x128xbf16, #tpu.memory_space<vmem>>, %arg3: memref<128x128xbf16, #tpu.memory_space<vmem>>, %arg4: memref<1x128xf32, #tpu.memory_space<vmem>>, %arg5: memref<128x128xf32, #tpu.memory_space<vmem>>, %arg6: memref<128x128xf32, #tpu.memory_space<vmem>>) attributes {dimension_semantics = [#tpu.dimension_semantics<parallel>, #tpu.dimension_semantics<arbitrary>], iteration_bounds = array<i64: 1, 1>, scalar_prefetch = 0 : i64, scratch_operands = 1 : i64, tpu.core_type = #tpu.core_type<tc>, window_params = [{transform_indices = @transform_0, window_bounds = array<i64: 128, 128>}, {transform_indices = @transform_1, window_bounds = array<i64: 128, 128>}, {pipeline_mode = #tpu.pipeline_mode<synchronous>, transform_indices = @transform_2, window_bounds = array<i64: 1, 128>}, {transform_indices = @transform_3, window_bounds = array<i64: 128, 128>}]} {
    %c0_i32 = arith.constant 0 : i32
    %0 = arith.cmpi eq, %arg1, %c0_i32 : i32
    %1 = arith.extui %0 : i1 to i32
    %c0_i32_0 = arith.constant 0 : i32
    %2 = arith.cmpi ne, %1, %c0_i32_0 : i32
    scf.if %2 {
      %cst_10 = arith.constant 0.000000e+00 : f32
      %12 = vector.broadcast %cst_10 : f32 to vector<128x128xf32>
      %c0_11 = arith.constant 0 : index
      %c0_12 = arith.constant 0 : index
      %13 = vector.load %arg6[%c0_11, %c0_12] : memref<128x128xf32, #tpu.memory_space<vmem>>, vector<128x128xf32>
      tpu.vector_store %arg6[%c0_11, %c0_12], %12 {strides = array<i32>} : memref<128x128xf32, #tpu.memory_space<vmem>>, vector<128x128xf32>,
    } else {
    }
    %c0 = arith.constant 0 : index
    %c0_1 = arith.constant 0 : index
    %3 = vector.load %arg6[%c0, %c0_1] : memref<128x128xf32, #tpu.memory_space<vmem>>, vector<128x128xf32>
    %c0_2 = arith.constant 0 : index
    %c0_3 = arith.constant 0 : index
    %4 = vector.load %arg2[%c0_2, %c0_3] : memref<128x128xbf16, #tpu.memory_space<vmem>>, vector<128x128xbf16>
    %c0_4 = arith.constant 0 : index
    %c0_5 = arith.constant 0 : index
    %5 = vector.load %arg3[%c0_4, %c0_5] : memref<128x128xbf16, #tpu.memory_space<vmem>>, vector<128x128xbf16>
    %cst = arith.constant dense<0.000000e+00> : vector<128x128xf32>
    %6 = tpu.matmul %4, %5, %cst {dimension_numbers = #tpu.dot_dimension_numbers<[1], [0], [0], [1], [0, 0, 1, 1], [], []>} : vector<128x128xbf16>, vector<128x128xbf16>, vector<128x128xf32> -> vector<128x128xf32>
    %7 = arith.addf %3, %6 : vector<128x128xf32>
    %c0_6 = arith.constant 0 : index
    %c0_7 = arith.constant 0 : index
    %8 = vector.load %arg6[%c0_6, %c0_7] : memref<128x128xf32, #tpu.memory_space<vmem>>, vector<128x128xf32>
    tpu.vector_store %arg6[%c0_6, %c0_7], %7 {strides = array<i32>} : memref<128x128xf32, #tpu.memory_space<vmem>>, vector<128x128xf32>,
    %c0_i32_8 = arith.constant 0 : i32
    %9 = arith.cmpi eq, %arg1, %c0_i32_8 : i32
    %10 = arith.extui %9 : i1 to i32
    %c0_i32_9 = arith.constant 0 : i32
    %11 = arith.cmpi ne, %10, %c0_i32_9 : i32
    scf.if %11 {
      %c0_10 = arith.constant 0 : index
      %c0_11 = arith.constant 0 : index
      %12 = vector.load %arg6[%c0_10, %c0_11] : memref<128x128xf32, #tpu.memory_space<vmem>>, vector<128x128xf32>
      %c0_12 = arith.constant 0 : index
      %c0_13 = arith.constant 0 : index
      %13 = vector.load %arg4[%c0_12, %c0_13] : memref<1x128xf32, #tpu.memory_space<vmem>>, vector<1x128xf32>
      %14 = vector.broadcast %13 : vector<1x128xf32> to vector<128x128xf32>
      %15 = arith.addf %12, %14 : vector<128x128xf32>
      %cst_14 = arith.constant 0.000000e+00 : f32
      %16 = vector.broadcast %cst_14 : f32 to vector<128x128xf32>
      %17 = arith.maximumf %15, %16 : vector<128x128xf32>
      %c0_15 = arith.constant 0 : index
      %c0_16 = arith.constant 0 : index
      %18 = vector.load %arg5[%c0_15, %c0_16] : memref<128x128xf32, #tpu.memory_space<vmem>>, vector<128x128xf32>
      tpu.vector_store %arg5[%c0_15, %c0_16], %17 {strides = array<i32>} : memref<128x128xf32, #tpu.memory_space<vmem>>, vector<128x128xf32>,
    } else {
    }
    return
  }
  func.func @transform_0(%arg0: i32, %arg1: i32) -> (i32, i32) {
    %c0_i32 = arith.constant 0 : i32
    return %arg0, %arg1 : i32, i32
  }
  func.func @transform_1(%arg0: i32, %arg1: i32) -> (i32, i32) {
    %c0_i32 = arith.constant 0 : i32
    %c0_i32_0 = arith.constant 0 : i32
    return %arg1, %c0_i32 : i32, i32
  }
  func.func @transform_2(%arg0: i32, %arg1: i32) -> (i32, i32) {
    %c0_i32 = arith.constant 0 : i32
    %c0_i32_0 = arith.constant 0 : i32
    %c0_i32_1 = arith.constant 0 : i32
    return %c0_i32, %c0_i32_0 : i32, i32
  }
  func.func @transform_3(%arg0: i32, %arg1: i32) -> (i32, i32) {
    %c0_i32 = arith.constant 0 : i32
    %c0_i32_0 = arith.constant 0 : i32
    return %arg0, %c0_i32 : i32, i32
  }
}

module attributes {stable_mosaic.version = 11 : i64} {
  func.func @_xw_kernel(%arg0: i32, %arg1: memref<128x128xf32, #tpu.memory_space<vmem>>, %arg2: memref<128x128xbf16, #tpu.memory_space<vmem>>, %arg3: memref<128x128xbf16, #tpu.memory_space<vmem>>) attributes {dimension_semantics = [#tpu.dimension_semantics<parallel>], iteration_bounds = array<i64: 1>, scalar_prefetch = 0 : i64, scratch_operands = 0 : i64, tpu.core_type = #tpu.core_type<tc>, window_params = [{transform_indices = @transform_0, window_bounds = array<i64: 128, 128>}, {pipeline_mode = #tpu.pipeline_mode<synchronous>, transform_indices = @transform_1, window_bounds = array<i64: 128, 128>}, {transform_indices = @transform_2, window_bounds = array<i64: 128, 128>}]} {
    %c0 = arith.constant 0 : index
    %c0_0 = arith.constant 0 : index
    %0 = vector.load %arg1[%c0, %c0_0] : memref<128x128xf32, #tpu.memory_space<vmem>>, vector<128x128xf32>
    %1 = arith.truncf %0 : vector<128x128xf32> to vector<128x128xbf16>
    %c0_1 = arith.constant 0 : index
    %c0_2 = arith.constant 0 : index
    %2 = vector.load %arg2[%c0_1, %c0_2] : memref<128x128xbf16, #tpu.memory_space<vmem>>, vector<128x128xbf16>
    %cst = arith.constant dense<0.000000e+00> : vector<128x128xf32>
    %3 = tpu.matmul %1, %2, %cst {dimension_numbers = #tpu.dot_dimension_numbers<[1], [0], [0], [1], [0, 0, 1, 1], [], []>} : vector<128x128xbf16>, vector<128x128xbf16>, vector<128x128xf32> -> vector<128x128xf32>
    %4 = arith.truncf %3 : vector<128x128xf32> to vector<128x128xbf16>
    %c0_3 = arith.constant 0 : index
    %c0_4 = arith.constant 0 : index
    %5 = vector.load %arg3[%c0_3, %c0_4] : memref<128x128xbf16, #tpu.memory_space<vmem>>, vector<128x128xbf16>
    tpu.vector_store %arg3[%c0_3, %c0_4], %4 {strides = array<i32>} : memref<128x128xbf16, #tpu.memory_space<vmem>>, vector<128x128xbf16>,
    return
  }
  func.func @transform_0(%arg0: i32) -> (i32, i32) {
    %c0_i32 = arith.constant 0 : i32
    %c0_i32_0 = arith.constant 0 : i32
    return %arg0, %c0_i32 : i32, i32
  }
  func.func @transform_1(%arg0: i32) -> (i32, i32) {
    %c0_i32 = arith.constant 0 : i32
    %c0_i32_0 = arith.constant 0 : i32
    %c0_i32_1 = arith.constant 0 : i32
    return %c0_i32, %c0_i32_0 : i32, i32
  }
  func.func @transform_2(%arg0: i32) -> (i32, i32) {
    %c0_i32 = arith.constant 0 : i32
    %c0_i32_0 = arith.constant 0 : i32
    return %arg0, %c0_i32 : i32, i32
  }
}

</mosaic_0001>

<bundles_post_ra>
// kernel: gcn_encoder_forward.5
= control target key start
LH: loop header
LB: loop body
LE: loop exit
PB: predicated region body
PF: predicated region fallthrough
CT: control target
= control target key end

     0   :  { %s602_s1 = inlined_call_operand.vmem [shape: bf16[128,128], index: 1, kind: input, shape index: {}]   ;;  %s603_s0 = inlined_call_operand.vmem [shape: bf16[128,128], index: 0, kind: input, shape index: {}]   ;;  %s604_s2 = inlined_call_operand.vmem [shape: f32[1,128], index: 2, kind: input, shape index: {}]   ;;  %s605_s3 = inlined_call_operand.vmem [shape: f32[128,128], index: 3, kind: output, shape index: {}]  }
   0x1   :  { %v467_v0 = vld [vmem:[%s602_s1] sm:$0xff]   ;;  %v468_v1 = vld [vmem:[%s602_s1 + $0x8] sm:$0xff]   ;;  %v469_v2 = vld [vmem:[%s602_s1 + $0x10] sm:$0xff]  }
   0x2   :  { %419 = vmatprep.subr.bf16.mxu0 %v467_v0  ;;  %451 = vmatprep.subr.bf16.mxu1 %v467_v0  ;;  %v470_v3 = vld [vmem:[%s602_s1 + $0x18] sm:$0xff]   ;;  %v475_v4 = vld [vmem:[%s603_s0] sm:$0xff]   ;;  %v472_v7 = vld [vmem:[%s602_s1 + $0x28] sm:$0xff]  }
   0x3   :  { %420 = vmatpush3.bf16.msra.mxu0 %v467_v0  ;;  %459 = vmatpush3.bf16.msra.mxu1 %v467_v0  ;;  %v476_v5 = vld [vmem:[%s603_s0 + $0x20] sm:$0xff]   ;;  %v473_v8 = vld [vmem:[%s602_s1 + $0x30] sm:$0xff]   ;;  %v474_v9 = vld [vmem:[%s602_s1 + $0x38] sm:$0xff]  }
   0x4   :  { %421 = vmatprep.subr.bf16.mxu0 %v468_v1  ;;  %452 = vmatprep.subr.bf16.mxu1 %v468_v1  ;;  %v471_v6 = vld [vmem:[%s602_s1 + $0x20] sm:$0xff]   ;;  %v477_v10 = vld [vmem:[%s603_s0 + $0x8] sm:$0xff]   ;;  %v479_v12 = vld [vmem:[%s603_s0 + $0x10] sm:$0xff]  }
   0x5   :  { %435 = vmatprep.mubr.bf16.mxu0 %v475_v4  ;;  %443 = vmatprep.mubr.bf16.mxu1 %v476_v5  ;;  %v478_v11 = vld [vmem:[%s603_s0 + $0x28] sm:$0xff]   ;;  %v480_v13 = vld [vmem:[%s603_s0 + $0x30] sm:$0xff]   ;;  %v481_v14 = vld [vmem:[%s603_s0 + $0x18] sm:$0xff]  }
   0x6   :  { %v482_v15 = vld [vmem:[%s603_s0 + $0x38] sm:$0xff]   ;;  %v402_v16 = vld [vmem:[%s604_s2] ss:$0 sm:$0xff] }
   0x7   :  { %422 = vmatpush3.bf16.msra.mxu0 %v468_v1  ;;  %460 = vmatpush3.bf16.msra.mxu1 %v468_v1 }
   0x8   :  { %423 = vmatprep.subr.bf16.mxu0 %v469_v2  ;;  %453 = vmatprep.subr.bf16.mxu1 %v469_v2 }
   0xb   :  { %424 = vmatpush3.bf16.msra.mxu0 %v469_v2  ;;  %461 = vmatpush3.bf16.msra.mxu1 %v469_v2 }
   0xc   :  { %425 = vmatprep.subr.bf16.mxu0 %v470_v3  ;;  %454 = vmatprep.subr.bf16.mxu1 %v470_v3 }
   0xf   :  { %426 = vmatpush3.bf16.msra.mxu0 %v470_v3  ;;  %462 = vmatpush3.bf16.msra.mxu1 %v470_v3 }
  0x10   :  { %427 = vmatprep.subr.bf16.mxu0 %v471_v6  ;;  %455 = vmatprep.subr.bf16.mxu1 %v471_v6 }
  0x13   :  { %428 = vmatpush3.bf16.msra.mxu0 %v471_v6  ;;  %463 = vmatpush3.bf16.msra.mxu1 %v471_v6 }
  0x14   :  { %429 = vmatprep.subr.bf16.mxu0 %v472_v7  ;;  %456 = vmatprep.subr.bf16.mxu1 %v472_v7 }
  0x17   :  { %430 = vmatpush3.bf16.msra.mxu0 %v472_v7  ;;  %464 = vmatpush3.bf16.msra.mxu1 %v472_v7 }
  0x18   :  { %431 = vmatprep.subr.bf16.mxu0 %v473_v8  ;;  %457 = vmatprep.subr.bf16.mxu1 %v473_v8 }
  0x1b   :  { %432 = vmatpush3.bf16.msra.mxu0 %v473_v8  ;;  %465 = vmatpush3.bf16.msra.mxu1 %v473_v8 }
  0x1c   :  { %433 = vmatprep.subr.bf16.mxu0 %v474_v9  ;;  %458 = vmatprep.subr.bf16.mxu1 %v474_v9 }
  0x1f   :  { %434 = vmatpush3.bf16.msra.mxu0 %v474_v9  ;;  %466 = vmatpush3.bf16.msra.mxu1 %v474_v9 }
  0x22   :  { %436 = vmatmul.mubr.bf16.vlgmr.msra.gmra.mrb[0].mxu0 %v477_v10  ;;  %444 = vmatmul.mubr.bf16.vlgmr.msra.gmra.mrb[0].mxu1 %v478_v11 }
  0x23   :  { %439 = vmatprep.mubr.bf16.mxu0 %v479_v12  ;;  %447 = vmatprep.mubr.bf16.mxu1 %v480_v13 }
  0x2a   :  { %440 = vmatmul.mubr.bf16.gmra.mrb[4].mxu0 %v481_v14  ;;  %448 = vmatmul.mubr.bf16.gmra.mrb[4].mxu1 %v482_v15 }
  0xf5   :  { %v437_v17 = vpop.f32.mrb[0].mxu0  ;;  %v445_v18 = vpop.f32.mrb[0].mxu1 }
  0xf6   :  { %v336_v19 = vadd.f32 %v437_v17, %v402_v16  ;;  %v344_v20 = vadd.f32 %v445_v18, %v402_v16  ;;  %v213_v21 = vpop.f32.mrb[1].mxu0  ;;  %v245_v22 = vpop.f32.mrb[1].mxu1 }
  0xf7   :  { %v334_v23 = vadd.f32 %v402_v16, %v213_v21  ;;  %v342_v24 = vadd.f32 %v402_v16, %v245_v22  ;;  %v438_v25 = vpop.f32.mrb[2].mxu0  ;;  %v446_v26 = vpop.f32.mrb[2].mxu1 }
  0xf8   :  { %v352_v27 = vmax.f32 %v336_v19, 0.0  ;;  %v360_v28 = vmax.f32 %v344_v20, 0.0  ;;  %v337_v29 = vadd.f32 %v438_v25, %v402_v16  ;;  %v345_v30 = vadd.f32 %v446_v26, %v402_v16  ;;  %v216_v31 = vpop.f32.mrb[3].mxu0  ;;  %v248_v32 = vpop.f32.mrb[3].mxu1 }
  0xf9   :  { %v350_v33 = vmax.f32 %v334_v23, 0.0  ;;  %v358_v34 = vmax.f32 %v342_v24, 0.0  ;;  %v335_v35 = vadd.f32 %v402_v16, %v216_v31  ;;  %v343_v36 = vadd.f32 %v402_v16, %v248_v32 }
  0xfa   :  { %368 = vst [vmem:[%s605_s3 + $0x10] sm:$0xff] %v352_v27  ;;  %376 = vst [vmem:[%s605_s3 + $0x50] sm:$0xff] %v360_v28  ;;  %v353_v37 = vmax.f32 %v337_v29, 0.0  ;;  %v361_v38 = vmax.f32 %v345_v30, 0.0 }
  0xfb   :  { %366 = vst [vmem:[%s605_s3] sm:$0xff] %v350_v33  ;;  %374 = vst [vmem:[%s605_s3 + $0x40] sm:$0xff] %v358_v34  ;;  %v351_v39 = vmax.f32 %v335_v35, 0.0  ;;  %v359_v40 = vmax.f32 %v343_v36, 0.0 }
  0xfc   :  { %369 = vst [vmem:[%s605_s3 + $0x18] sm:$0xff] %v353_v37  ;;  %377 = vst [vmem:[%s605_s3 + $0x58] sm:$0xff] %v361_v38 }
  0xfd   :  { %367 = vst [vmem:[%s605_s3 + $0x8] sm:$0xff] %v351_v39  ;;  %375 = vst [vmem:[%s605_s3 + $0x48] sm:$0xff] %v359_v40  ;;  %v441_v41 = vpop.f32.mrb[4].mxu0  ;;  %v449_v42 = vpop.f32.mrb[4].mxu1 }
  0xfe   :  { %v340_v43 = vadd.f32 %v441_v41, %v402_v16  ;;  %v348_v44 = vadd.f32 %v449_v42, %v402_v16  ;;  %v229_v45 = vpop.f32.mrb[5].mxu0  ;;  %v261_v46 = vpop.f32.mrb[5].mxu1 }
  0xff   :  { %v338_v47 = vadd.f32 %v402_v16, %v229_v45  ;;  %v346_v48 = vadd.f32 %v402_v16, %v261_v46  ;;  %v442_v49 = vpop.f32.mrb[6].mxu0  ;;  %v450_v50 = vpop.f32.mrb[6].mxu1 }
 0x100   :  { %v356_v51 = vmax.f32 %v340_v43, 0.0  ;;  %v364_v52 = vmax.f32 %v348_v44, 0.0  ;;  %v341_v53 = vadd.f32 %v442_v49, %v402_v16  ;;  %v349_v54 = vadd.f32 %v450_v50, %v402_v16  ;;  %v232_v55 = vpop.f32.mrb[7].mxu0  ;;  %v264_v56 = vpop.f32.mrb[7].mxu1 }
 0x101   :  { %v354_v57 = vmax.f32 %v338_v47, 0.0  ;;  %v362_v58 = vmax.f32 %v346_v48, 0.0  ;;  %v339_v59 = vadd.f32 %v402_v16, %v232_v55  ;;  %v347_v60 = vadd.f32 %v402_v16, %v264_v56 }
 0x102   :  { %372 = vst [vmem:[%s605_s3 + $0x30] sm:$0xff] %v356_v51  ;;  %380 = vst [vmem:[%s605_s3 + $0x70] sm:$0xff] %v364_v52  ;;  %v357_v61 = vmax.f32 %v341_v53, 0.0  ;;  %v365_v62 = vmax.f32 %v349_v54, 0.0 }
 0x103   :  { %370 = vst [vmem:[%s605_s3 + $0x20] sm:$0xff] %v354_v57  ;;  %378 = vst [vmem:[%s605_s3 + $0x60] sm:$0xff] %v362_v58  ;;  %v355_v63 = vmax.f32 %v339_v59, 0.0  ;;  %v363_v0 = vmax.f32 %v347_v60, 0.0 }
 0x104   :  { %373 = vst [vmem:[%s605_s3 + $0x38] sm:$0xff] %v357_v61  ;;  %381 = vst [vmem:[%s605_s3 + $0x78] sm:$0xff] %v365_v62 }
 0x105   :  { %371 = vst [vmem:[%s605_s3 + $0x28] sm:$0xff] %v355_v63  ;;  %379 = vst [vmem:[%s605_s3 + $0x68] sm:$0xff] %v363_v0 }

// kernel: gcn_encoder_forward.4
= control target key start
LH: loop header
LB: loop body
LE: loop exit
PB: predicated region body
PF: predicated region fallthrough
CT: control target
= control target key end

     0   :  { %s551_s1 = inlined_call_operand.vmem [shape: bf16[128,128], index: 1, kind: input, shape index: {}]   ;;  %s552_s0 = inlined_call_operand.vmem [shape: f32[128,128], index: 0, kind: input, shape index: {}]   ;;  %s553_s2 = inlined_call_operand.vmem [shape: bf16[128,128], index: 2, kind: output, shape index: {}]  }
   0x1   :  { %v432_v0 = vld [vmem:[%s551_s1] sm:$0xff]   ;;  %v433_v1 = vld [vmem:[%s551_s1 + $0x8] sm:$0xff]   ;;  %v434_v2 = vld [vmem:[%s551_s1 + $0x10] sm:$0xff]  }
   0x2   :  { %384 = vmatprep.subr.bf16.mxu0 %v432_v0  ;;  %416 = vmatprep.subr.bf16.mxu1 %v432_v0  ;;  %v435_v3 = vld [vmem:[%s551_s1 + $0x18] sm:$0xff]   ;;  %v12_v4 = vld [vmem:[%s552_s0] sm:$0xff]  ;;  %v13_v5 = vld [vmem:[%s552_s0 + $0x8] sm:$0xff] }
   0x3   :  { %385 = vmatpush3.bf16.msra.mxu0 %v432_v0  ;;  %424 = vmatpush3.bf16.msra.mxu1 %v432_v0  ;;  %v20_v6 = vld [vmem:[%s552_s0 + $0x40] sm:$0xff]  ;;  %v28_v7 = vpack.c.bf16 %v13_v5, %v12_v4  ;;  %v21_v8 = vld [vmem:[%s552_s0 + $0x48] sm:$0xff]  ;;  %v438_v12 = vld [vmem:[%s551_s1 + $0x30] sm:$0xff]  }
   0x4   :  { %386 = vmatprep.subr.bf16.mxu0 %v433_v1  ;;  %417 = vmatprep.subr.bf16.mxu1 %v433_v1  ;;  %v32_v9 = vpack.c.bf16 %v21_v8, %v20_v6  ;;  %v436_v10 = vld [vmem:[%s551_s1 + $0x20] sm:$0xff]   ;;  %v437_v11 = vld [vmem:[%s551_s1 + $0x28] sm:$0xff]   ;;  %v439_v13 = vld [vmem:[%s551_s1 + $0x38] sm:$0xff]  }
   0x5   :  { %400 = vmatprep.mubr.bf16.mxu0 %v28_v7  ;;  %v14_v14 = vld [vmem:[%s552_s0 + $0x10] sm:$0xff]  ;;  %v15_v15 = vld [vmem:[%s552_s0 + $0x18] sm:$0xff]  ;;  %v16_v18 = vld [vmem:[%s552_s0 + $0x20] sm:$0xff] }
   0x6   :  { %408 = vmatprep.mubr.bf16.mxu1 %v32_v9  ;;  %v22_v16 = vld [vmem:[%s552_s0 + $0x50] sm:$0xff]  ;;  %v23_v17 = vld [vmem:[%s552_s0 + $0x58] sm:$0xff]  ;;  %v17_v19 = vld [vmem:[%s552_s0 + $0x28] sm:$0xff]  ;;  %v29_v22 = vpack.c.bf16 %v15_v15, %v14_v14 }
   0x7   :  { %387 = vmatpush3.bf16.msra.mxu0 %v433_v1  ;;  %425 = vmatpush3.bf16.msra.mxu1 %v433_v1  ;;  %v24_v20 = vld [vmem:[%s552_s0 + $0x60] sm:$0xff]  ;;  %v25_v21 = vld [vmem:[%s552_s0 + $0x68] sm:$0xff]  ;;  %v33_v23 = vpack.c.bf16 %v23_v17, %v22_v16  ;;  %v30_v24 = vpack.c.bf16 %v17_v19, %v16_v18  ;;  %v18_v26 = vld [vmem:[%s552_s0 + $0x30] sm:$0xff] }
   0x8   :  { %388 = vmatprep.subr.bf16.mxu0 %v434_v2  ;;  %418 = vmatprep.subr.bf16.mxu1 %v434_v2  ;;  %v34_v25 = vpack.c.bf16 %v25_v21, %v24_v20  ;;  %v19_v27 = vld [vmem:[%s552_s0 + $0x38] sm:$0xff]  ;;  %v26_v28 = vld [vmem:[%s552_s0 + $0x70] sm:$0xff] }
   0x9   :  { %v27_v29 = vld [vmem:[%s552_s0 + $0x78] sm:$0xff]  ;;  %v31_v30 = vpack.c.bf16 %v19_v27, %v18_v26 }
   0xa   :  { %v35_v31 = vpack.c.bf16 %v27_v29, %v26_v28 }
   0xb   :  { %389 = vmatpush3.bf16.msra.mxu0 %v434_v2  ;;  %426 = vmatpush3.bf16.msra.mxu1 %v434_v2 }
   0xc   :  { %390 = vmatprep.subr.bf16.mxu0 %v435_v3  ;;  %419 = vmatprep.subr.bf16.mxu1 %v435_v3 }
   0xf   :  { %391 = vmatpush3.bf16.msra.mxu0 %v435_v3  ;;  %427 = vmatpush3.bf16.msra.mxu1 %v435_v3 }
  0x10   :  { %392 = vmatprep.subr.bf16.mxu0 %v436_v10  ;;  %420 = vmatprep.subr.bf16.mxu1 %v436_v10 }
  0x13   :  { %393 = vmatpush3.bf16.msra.mxu0 %v436_v10  ;;  %428 = vmatpush3.bf16.msra.mxu1 %v436_v10 }
  0x14   :  { %394 = vmatprep.subr.bf16.mxu0 %v437_v11  ;;  %421 = vmatprep.subr.bf16.mxu1 %v437_v11 }
  0x17   :  { %395 = vmatpush3.bf16.msra.mxu0 %v437_v11  ;;  %429 = vmatpush3.bf16.msra.mxu1 %v437_v11 }
  0x18   :  { %396 = vmatprep.subr.bf16.mxu0 %v438_v12  ;;  %422 = vmatprep.subr.bf16.mxu1 %v438_v12 }
  0x1b   :  { %397 = vmatpush3.bf16.msra.mxu0 %v438_v12  ;;  %430 = vmatpush3.bf16.msra.mxu1 %v438_v12 }
  0x1c   :  { %398 = vmatprep.subr.bf16.mxu0 %v439_v13  ;;  %423 = vmatprep.subr.bf16.mxu1 %v439_v13 }
  0x1f   :  { %399 = vmatpush3.bf16.msra.mxu0 %v439_v13  ;;  %431 = vmatpush3.bf16.msra.mxu1 %v439_v13 }
  0x22   :  { %401 = vmatmul.mubr.bf16.vlgmr.msra.gmra.mrb[0].mxu0 %v29_v22  ;;  %409 = vmatmul.mubr.bf16.vlgmr.msra.gmra.mrb[0].mxu1 %v33_v23 }
  0x23   :  { %404 = vmatprep.mubr.bf16.mxu0 %v30_v24  ;;  %412 = vmatprep.mubr.bf16.mxu1 %v34_v25 }
  0x2a   :  { %405 = vmatmul.mubr.bf16.gmra.mrb[4].mxu0 %v31_v30  ;;  %413 = vmatmul.mubr.bf16.gmra.mrb[4].mxu1 %v35_v31 }
  0xf5   :  { %v402_v32 = vpop.f32.mrb[0].mxu0  ;;  %v410_v33 = vpop.f32.mrb[0].mxu1 }
  0xf6   :  { %v134_v34 = vpop.f32.mrb[1].mxu0  ;;  %v166_v35 = vpop.f32.mrb[1].mxu1 }
  0xf7   :  { %v403_v36 = vpop.f32.mrb[2].mxu0  ;;  %v411_v37 = vpop.f32.mrb[2].mxu1 }
  0xf8   :  { %v329_v38 = vpack.c.bf16 %v403_v36, %v402_v32  ;;  %v349_v39 = vpack.c.bf16 %v411_v37, %v410_v33  ;;  %v137_v40 = vpop.f32.mrb[3].mxu0  ;;  %v169_v41 = vpop.f32.mrb[3].mxu1 }
  0xf9   :  { %v324_v42 = vpack.c.bf16 %v137_v40, %v134_v34  ;;  %v344_v43 = vpack.c.bf16 %v169_v41, %v166_v35 }
  0xfa   :  { %361 = vst [vmem:[%s553_s2 + $0x8] sm:$0xff] %v329_v38   ;;  %365 = vst [vmem:[%s553_s2 + $0x28] sm:$0xff] %v349_v39  }
  0xfb   :  { %325 = vst [vmem:[%s553_s2] sm:$0xff] %v324_v42   ;;  %364 = vst [vmem:[%s553_s2 + $0x20] sm:$0xff] %v344_v43  }
  0xfd   :  { %v406_v44 = vpop.f32.mrb[4].mxu0  ;;  %v414_v45 = vpop.f32.mrb[4].mxu1 }
  0xfe   :  { %v150_v46 = vpop.f32.mrb[5].mxu0  ;;  %v182_v47 = vpop.f32.mrb[5].mxu1 }
  0xff   :  { %v407_v48 = vpop.f32.mrb[6].mxu0  ;;  %v415_v49 = vpop.f32.mrb[6].mxu1 }
 0x100   :  { %v339_v50 = vpack.c.bf16 %v407_v48, %v406_v44  ;;  %v359_v51 = vpack.c.bf16 %v415_v49, %v414_v45  ;;  %v153_v52 = vpop.f32.mrb[7].mxu0  ;;  %v185_v53 = vpop.f32.mrb[7].mxu1 }
 0x101   :  { %v334_v54 = vpack.c.bf16 %v153_v52, %v150_v46  ;;  %v354_v55 = vpack.c.bf16 %v185_v53, %v182_v47 }
 0x102   :  { %363 = vst [vmem:[%s553_s2 + $0x18] sm:$0xff] %v339_v50   ;;  %367 = vst [vmem:[%s553_s2 + $0x38] sm:$0xff] %v359_v51  }
 0x103   :  { %362 = vst [vmem:[%s553_s2 + $0x10] sm:$0xff] %v334_v54   ;;  %366 = vst [vmem:[%s553_s2 + $0x30] sm:$0xff] %v354_v55  }

</bundles_post_ra>
